<compile_context>
chip_gen: v5e
topology: v5e:2x2
jax: 0.10.0
libtpu: 0.0.40
codegen_flags: <defaults>
</compile_context>

<pallas_src>
import functools

import jax
import jax.numpy as jnp
from jax.experimental import pallas as pl
from jax.experimental.pallas import tpu as pltpu


_LANE_CANDIDATES = (4096, 2048, 1024, 512, 256, 128)
_VMEM_LIMIT_BYTES = 48 * 1024 * 1024   # safe: < 64 MiB (v7x) and < 128 MiB (v5e/v6e)


def _round_up(x: int, m: int) -> int:
    return ((x + m - 1) // m) * m


def _chip_kind() -> str:
    try:
        return jax.devices()[0].device_kind.lower()
    except Exception:  # defensive: never fail the wrapper on introspection
        return ""


def _swish_kernel(x_ref, o_ref, *, compute_dtype):
    # swish(x) = x * sigmoid(x) = h * (1 + tanh(h)),  h = x / 2.
    # tanh is the single EUP transcendental per element; the mul/add ride the
    # otherwise-idle VPU slots, so the HBM DMA stays the sole bottleneck.
    h = 0.5 * x_ref[...].astype(compute_dtype)
    o_ref[...] = (h * (1.0 + jnp.tanh(h))).astype(o_ref.dtype)


def swish(x: jax.Array) -> jax.Array:
    """Elementwise x * sigmoid(x), matching the PyTorch Swish forward."""
    # TODO(synk): when this Swish directly follows a conv/matmul in SRGAN,
    # fuse it as an epilogue of that producer kernel instead of paying a
    # standalone HBM read+write round trip here.
    orig_shape = x.shape
    dtype = x.dtype
    n = x.size
    itemsize = jnp.dtype(dtype).itemsize
    pack = max(8, 32 // itemsize)          # sublane pack: 8 f32 / 16 bf16 / 32 int8

    kind = _chip_kind()
    is_v5 = "v5" in kind
    multi_core = "v7" in kind              # v7x: 2 TensorCores per chip

    # bf16 VPU/EUP are native on v6e/v7x; keep f32 math on v5e & other dtypes.
    compute_dtype = jnp.float32
    if dtype == jnp.bfloat16 and not is_v5:
        compute_dtype = jnp.bfloat16

    # --- Lane-dense (rows, lanes) factorization of the flat size -------------
    # Prefer factorizations whose row count is a multiple of the sublane pack
    # (full (8,128) tiles, unmasked vst); otherwise take the widest divisor;
    # otherwise pad the ragged tail (swish(0) == 0, sliced away afterwards).
    lanes = None
    for cand in _LANE_CANDIDATES:
        if n % cand == 0 and (n // cand) % pack == 0:
            lanes = cand
            break
    if lanes is None:
        for cand in _LANE_CANDIDATES:
            if n % cand == 0:
                lanes = cand
                break

    if lanes is None:
        # TODO(synk): handle the ragged tail in-kernel (masked store on the
        # last block) instead of a padded copy + trailing output slice.
        lanes = 128
        n_pad = _round_up(n, lanes)
        x_flat = jnp.pad(jnp.ravel(x), (0, n_pad - n))
    else:
        n_pad = n
        x_flat = jnp.ravel(x)

    rows = n_pad // lanes
    x2d = x_flat.reshape(rows, lanes)

    # --- Block sizing ---------------------------------------------------------
    # ~8 MiB/buffer on v7x (3.2 TB/s makes per-step fixed cost expensive),
    # ~4 MiB elsewhere (roofline knee on v6e).  In+out double-buffered copies
    # stay well inside the explicit 48 MiB VMEM limit on every generation.
    target_block_bytes = (8 if multi_core else 4) * 1024 * 1024
    target_rows = max(pack, (target_block_bytes // (lanes * itemsize)) // pack * pack)
    block_rows = min(rows, target_rows)
    # If block_rows < rows it equals target_rows (a pack multiple); if it
    # equals rows it is the full dim -- both satisfy the (8,128) rule.

    if multi_core and rows >= 4 * pack:
        g = pl.cdiv(rows, block_rows)
        if g < 4:
            # Feed both v7x TensorCores: >=4 steps so each core gets >=2 and
            # can pipeline DMA with compute.
            block_rows = _round_up(pl.cdiv(rows, 4), pack)
        elif g % 2 == 1:
            # Even step count keeps both cores busy through the tail.
            block_rows = _round_up(pl.cdiv(rows, g + 1), pack)

    grid = (pl.cdiv(rows, block_rows),)  # ragged last block masked by Pallas

    kernel = functools.partial(_swish_kernel, compute_dtype=compute_dtype)

    out2d = pl.pallas_call(
        kernel,
        out_shape=jax.ShapeDtypeStruct((rows, lanes), dtype),
        grid_spec=pltpu.PrefetchScalarGridSpec(
            num_scalar_prefetch=0,
            grid=grid,
            in_specs=[pl.BlockSpec((block_rows, lanes), lambda i: (i, 0))],
            out_specs=pl.BlockSpec((block_rows, lanes), lambda i: (i, 0)),
        ),
        compiler_params=pltpu.CompilerParams(
            dimension_semantics=("parallel",),
            vmem_limit_bytes=_VMEM_LIMIT_BYTES,
        ),
        cost_estimate=pl.CostEstimate(
            flops=4 * n_pad,
            transcendentals=n_pad,
            bytes_accessed=2 * n_pad * itemsize,
        ),
    )(x2d)

    out_flat = out2d.reshape(-1)
    if n_pad != n:
        out_flat = out_flat[:n]
    return out_flat.reshape(orig_shape)


if __name__ == "__main__":
    key = jax.random.PRNGKey(0)
    x = jax.random.normal(key, (2, 4, 16, 16), dtype=jnp.float32)  # NCHW

    y = swish(x)
    jax.block_until_ready(y)

    # Reference check in plain JAX.  The tanh formulation matches
    # x * jax.nn.sigmoid(x) to ~f32 precision (no approx reciprocal anymore).
    y_ref = x * jax.nn.sigmoid(x)
    assert y.shape == x.shape and y.dtype == x.dtype
    assert jnp.allclose(y, y_ref, atol=1e-4, rtol=1e-4)

    print("KERNEL_OK")
</pallas_src>

<mosaic_0001>
module attributes {stable_mosaic.version = 11 : i64} {
  func.func @_swish_kernel(%arg0: i32, %arg1: memref<8x256xf32, #tpu.memory_space<vmem>>, %arg2: memref<8x256xf32, #tpu.memory_space<vmem>>) attributes {dimension_semantics = [#tpu.dimension_semantics<parallel>], iteration_bounds = array<i64: 1>, scalar_prefetch = 0 : i64, scratch_operands = 0 : i64, tpu.core_type = #tpu.core_type<tc>, window_params = [{transform_indices = @transform_0, window_bounds = array<i64: 8, 256>}, {transform_indices = @transform_1, window_bounds = array<i64: 8, 256>}]} {
    %c0 = arith.constant 0 : index
    %c0_0 = arith.constant 0 : index
    %0 = vector.load %arg1[%c0, %c0_0] : memref<8x256xf32, #tpu.memory_space<vmem>>, vector<8x256xf32>
    %cst = arith.constant 5.000000e-01 : f32
    %1 = vector.broadcast %cst : f32 to vector<8x256xf32>
    %2 = arith.mulf %1, %0 : vector<8x256xf32>
    %3 = math.tanh %2 : vector<8x256xf32>
    %cst_1 = arith.constant 1.000000e+00 : f32
    %4 = vector.broadcast %cst_1 : f32 to vector<8x256xf32>
    %5 = arith.addf %4, %3 : vector<8x256xf32>
    %6 = arith.mulf %2, %5 : vector<8x256xf32>
    %c0_2 = arith.constant 0 : index
    %c0_3 = arith.constant 0 : index
    %7 = vector.load %arg2[%c0_2, %c0_3] : memref<8x256xf32, #tpu.memory_space<vmem>>, vector<8x256xf32>
    tpu.vector_store %arg2[%c0_2, %c0_3], %6 {strides = array<i32>} : memref<8x256xf32, #tpu.memory_space<vmem>>, vector<8x256xf32>,
    return
  }
  func.func @transform_0(%arg0: i32) -> (i32, i32) {
    %c0_i32 = arith.constant 0 : i32
    %c0_i32_0 = arith.constant 0 : i32
    return %arg0, %c0_i32 : i32, i32
  }
  func.func @transform_1(%arg0: i32) -> (i32, i32) {
    %c0_i32 = arith.constant 0 : i32
    %c0_i32_0 = arith.constant 0 : i32
    return %arg0, %c0_i32 : i32, i32
  }
}

</mosaic_0001>

<bundles_post_ra>
// kernel: tpu_custom_call.1
= control target key start
LH: loop header
LB: loop body
LE: loop exit
PB: predicated region body
PF: predicated region fallthrough
CT: control target
= control target key end

     0   :  { %6 = vsyncpa [#allocation3], 0  ;;  %s128_s0 = inlined_call_operand.hbm [shape: f32[8,256], index: 0, kind: input, shape index: {}]   ;;  %s129_s1 = inlined_call_operand.hbm [shape: f32[8,256], index: 1, kind: output, shape index: {}]  }
   0x1   :  { %7 = vsyncpa [#allocation4], 0  ;;  %s13_s8 = sshll.u32 %s128_s0, 4  ;;  %s110_s9 = smov [#allocation2]   ;;  %s14_s8 = int_to_ptr.hbm [resolvable:$true] %s13_s8 }
   0x2   :  { %s15_s10 = sshll.u32 %s110_s9, 4  ;;  %s16_s10 = int_to_ptr.vmem [resolvable:$true] %s15_s10 }
   0x3   :  { %18 = dma.hbm_to_vmem [thread:$0]  %s14_s8, 256, %s16_s10, [#allocation3]  }
   0x4   :  { %106 = dma.done.wait [#allocation3], 256  }
   0x5   :  { %107 = vsyncadd [#allocation3], 4294967040  ;;  %v23_v0 = vld [vmem:[#allocation2] sm:$0xff]  ;;  %v24_v1 = vld [vmem:[#allocation2 + $0x8] sm:$0xff]  ;;  %s111_s11 = smov [#allocation5]   ;;  %s42_s14 = sshll.u32 %s129_s1, 4  ;;  %s43_s14 = int_to_ptr.hbm [resolvable:$true] %s42_s14 }
   0x6   :  { %v25_v2 = vmul.f32 0.5, %v23_v0  ;;  %v26_v3 = vmul.f32 0.5, %v24_v1  ;;  %s40_s12 = sshll.u32 %s111_s11, 4  ;;  %s41_s12 = int_to_ptr.vmem [resolvable:$true] %s40_s12 }
   0x8   :  { %54 = vtanh.f32 %v25_v2 }
   0x9   :  { %56 = vtanh.f32 %v26_v3 }
   0xe   :  { %v55_v4 = vpop.eup %54 }
   0xf   :  { %v57_v5 = vpop.eup %56  ;;  %v29_v6 = vadd.f32 1.0, %v55_v4 }
  0x10   :  { %v30_v7 = vadd.f32 1.0, %v57_v5 }
  0x11   :  { %v31_v8 = vmul.f32 %v29_v6, %v25_v2 }
  0x12   :  { %v32_v9 = vmul.f32 %v30_v7, %v26_v3 }
  0x13   :  { %33 = vst [vmem:[#allocation5] sm:$0xff] %v31_v8 }
  0x14   :  { %34 = vst [vmem:[#allocation5 + $0x8] sm:$0xff] %v32_v9 }
  0x15   :  { %45 = dma.vmem_to_hbm [thread:$0]  %s41_s12, 256, %s43_s14, [#allocation4]  }
  0x16   :  { %108 = dma.done.wait [#allocation4], 256  }
  0x17   :  { %109 = vsyncadd [#allocation4], 4294967040 }
  0x18   :  { %50 = vsyncpa [#allocation3], 1 }
  0x19   :  { %51 = vsyncpa [#allocation4], 1 }

</bundles_post_ra>
